<compile_context>
chip_gen: v5e
topology: v5e:2x2
jax: 0.10.0
libtpu: 0.0.40
codegen_flags: <defaults>
</compile_context>

<pallas_src>
import jax
import jax.numpy as jnp
from jax.experimental import pallas as pl
from jax.experimental.pallas import tpu as pltpu


def _sge_kernel(wb_ref, x_ref, o_ref):
    # wb_ref : VMEM (T, 1, 2) f32 -- [..., 0] = per-(batch,group) scale,
    #                                [..., 1] = per-(batch,group) bias
    # x_ref, o_ref : VMEM (T, cg, hw) in the input dtype
    x = x_ref[...]
    hw_len = x.shape[-1]
    inv_hw = jnp.float32(1.0 / hw_len)
    # NOTE: torch.std (unbiased) would produce NaN at h*w == 1; we guard the
    # 1/(hw-1) factor intentionally and document the divergence here.
    inv_hwm1 = jnp.float32(1.0 / max(hw_len - 1, 1))

    # AdaptiveAvgPool2d(1): spatial mean per channel of the group, f32
    # accumulation without keeping a full f32 copy of the block live.
    mean_c = jnp.sum(x, axis=-1, keepdims=True, dtype=jnp.float32) * inv_hw  # (T,cg,1)

    # xn[t, s] = sum_c x[t, c, s] * mean_c[t, c]  (f32 accumulation).
    xn = jnp.sum(x * mean_c.astype(x.dtype), axis=1, keepdims=True,
                 dtype=jnp.float32)                                          # (T,1,hw)

    # Normalize across the spatial axis (torch: unbiased std, eps after sqrt).
    m = jnp.sum(xn, axis=-1, keepdims=True) * inv_hw                         # (T,1,1)
    t = xn - m
    var = jnp.sum(t * t, axis=-1, keepdims=True) * inv_hwm1
    std = jnp.sqrt(var) + jnp.float32(1e-5)
    t = t / std          # exact divide: kernel is HBM-bound, precision is free

    # Per-(batch, group) affine + sigmoid gate, all in f32.
    wb = wb_ref[...]                                                         # (T,1,2)
    t = t * wb[:, :, 0:1] + wb[:, :, 1:2]
    gate = jax.nn.sigmoid(t)                                                 # (T,1,hw)

    # Final multiply in f32, single downcast to the output dtype.
    o_ref[...] = (x.astype(jnp.float32) * gate).astype(o_ref.dtype)


def _round_up(v, m):
    return -(-v // m) * m


def _tpu_params():
    """(vmem_capacity_bytes per TensorCore, TensorCores a 'parallel' axis feeds)."""
    kind = ""
    try:
        kind = jax.devices()[0].device_kind.lower()
    except Exception:
        pass
    is_v7 = "v7" in kind
    vmem_cap = (64 << 20) if is_v7 else (128 << 20)
    try:
        reported = getattr(pltpu.get_tpu_info(), "vmem_capacity_bytes", None)
        if reported:
            vmem_cap = min(int(reported), vmem_cap)
    except Exception:
        pass
    num_tc = 2 if (is_v7 or "v4" in kind or "v5p" in kind) else 1
    return vmem_cap, num_tc


def spatial_group_enhance(x, weight, bias, groups):
    """x: (b, c, h, w) NCHW; weight, bias: (1, groups, 1, 1). Returns (b, c, h, w)."""
    b, c, h, w = x.shape
    assert c % groups == 0
    cg = c // groups
    hw = h * w
    bg = b * groups
    itemsize = jnp.dtype(x.dtype).itemsize

    # ---- Glue reshapes in plain JAX: NCHW -> (b*groups, c//groups, h*w).
    #      No zero-padding of the bg axis: the last grid block may be ragged,
    #      which is safe because every reduction in the kernel is per-row.
    xg = x.reshape(bg, cg, hw)

    # Per-(batch, group) scale/bias packed into ONE (bg, 1, 2) f32 input so a
    # single tiny auxiliary DMA is issued per grid step.
    w_bg = jnp.tile(weight.reshape(groups).astype(jnp.float32), b)   # (bg,)
    b_bg = jnp.tile(bias.reshape(groups).astype(jnp.float32), b)     # (bg,)
    wb = jnp.stack([w_bg, b_bg], axis=-1).reshape(bg, 1, 2)

    # ---- Physical (lane/sublane-padded) per-row VMEM footprint.
    sub_mult = {4: 8, 2: 16, 1: 32}.get(itemsize, 8)
    cg_pad_nat = _round_up(cg, sub_mult)
    cg_pad_f32 = _round_up(cg, 8)
    hw_pad = _round_up(hw, 128)
    row_bytes_nat = cg_pad_nat * hw_pad * itemsize
    row_bytes_f32 = cg_pad_f32 * hw_pad * 4

    # ---- Generation-specific tile budget: ~8 MiB input blocks on 128-MiB-VMEM
    #      chips (v5e/v6e), ~4 MiB on v7x (64 MiB per TensorCore).
    vmem_cap, num_tc = _tpu_params()
    in_block_budget = max(1 << 20, vmem_cap // 16)
    bg_tile = max(1, in_block_budget // row_bytes_nat)
    bg_tile = min(bg_tile, bg)
    if num_tc > 1 and bg >= num_tc:
        # Only split into >= num_tc grid steps when there is more than one
        # TensorCore to feed; on single-TC v5e/v6e this clamp would just
        # double per-step overhead for nothing.
        bg_tile = min(bg_tile, pl.cdiv(bg, num_tc))
    grid_len = pl.cdiv(bg, bg_tile)

    # Live set: double-buffered in + out blocks (native dtype, physical layout)
    # plus ~2 full-block f32 temporaries (xn accumulation, final f32 multiply)
    # and a little slack for the small per-row statistics.
    live = bg_tile * (4 * row_bytes_nat + 2 * row_bytes_f32) + (2 << 20)
    vmem_limit = int(min(max(live, 32 << 20), max(int(0.75 * vmem_cap), 32 << 20)))

    cost = pl.CostEstimate(
        flops=8 * b * c * h * w,                      # a handful of VPU ops / element
        transcendentals=bg * hw,                      # sigmoid per spatial element
        bytes_accessed=2 * b * c * h * w * itemsize,  # read x once, write out once
    )

    out = pl.pallas_call(
        _sge_kernel,
        out_shape=jax.ShapeDtypeStruct((bg, cg, hw), x.dtype),
        grid_spec=pltpu.PrefetchScalarGridSpec(
            num_scalar_prefetch=0,
            grid=(grid_len,),
            in_specs=[
                pl.BlockSpec((bg_tile, 1, 2), lambda i: (i, 0, 0)),   # scale/bias rows
                pl.BlockSpec((bg_tile, cg, hw), lambda i: (i, 0, 0)),
            ],
            out_specs=pl.BlockSpec((bg_tile, cg, hw), lambda i: (i, 0, 0)),
        ),
        compiler_params=pltpu.CompilerParams(
            dimension_semantics=("parallel",),
            vmem_limit_bytes=vmem_limit,
        ),
        cost_estimate=cost,
    )(wb, xg)

    return out.reshape(b, c, h, w)
    # TODO(synk): for small, lane-sparse spatial sizes (hw = 49/196/784) the
    # output stores degrade to masked vst.msk and VMEM is ~2.6x inflated; if
    # profiling shows this dominating, pad hw to the next multiple of 128 in
    # the wrapper and mask the spatial mean/var with a broadcasted_iota lane
    # mask inside the kernel (one extra HBM pass, pays off only for small hw).


def _reference(x, weight, bias, groups):
    """Pure-JAX reference mirroring the PyTorch forward."""
    b, c, h, w = x.shape
    xg = x.reshape(b * groups, c // groups, h, w)
    avg = jnp.mean(xg, axis=(2, 3), keepdims=True)
    xn = jnp.sum(xg * avg, axis=1, keepdims=True)              # (b*g, 1, h, w)
    t = xn.reshape(b * groups, -1)
    t = t - jnp.mean(t, axis=1, keepdims=True)
    std = jnp.std(t, axis=1, keepdims=True, ddof=1) + 1e-5     # unbiased, like torch.std
    t = t / std
    t = t.reshape(b, groups, h, w)
    t = t * weight + bias
    t = t.reshape(b * groups, 1, h, w)
    out = xg * jax.nn.sigmoid(t)
    return out.reshape(b, c, h, w)


if __name__ == "__main__":
    key = jax.random.PRNGKey(0)
    kx, kw, kb = jax.random.split(key, 3)

    b, c, h, w = 2, 4, 16, 16
    groups = 2  # must divide c; module default is 64 but we use a small config

    x = jax.random.normal(kx, (b, c, h, w), dtype=jnp.float32)
    # Module __init__ uses zeros / ones; use deterministic random values here
    # (same shapes) so the affine+sigmoid path is exercised non-trivially.
    weight = 0.1 * jax.random.normal(kw, (1, groups, 1, 1), dtype=jnp.float32)
    bias = 1.0 + 0.1 * jax.random.normal(kb, (1, groups, 1, 1), dtype=jnp.float32)

    out = spatial_group_enhance(x, weight, bias, groups)
    out = jax.block_until_ready(out)

    ref = _reference(x, weight, bias, groups)
    assert out.shape == (b, c, h, w)
    err = float(jnp.max(jnp.abs(out - ref)))
    assert err < 1e-4, f"mismatch vs reference, max abs err = {err}"

    print("KERNEL_OK")
</pallas_src>

<mosaic_0001>
module attributes {stable_mosaic.version = 11 : i64} {
  func.func @_sge_kernel(%arg0: i32, %arg1: memref<4x1x2xf32, #tpu.memory_space<vmem>>, %arg2: memref<4x2x256xf32, #tpu.memory_space<vmem>>, %arg3: memref<4x2x256xf32, #tpu.memory_space<vmem>>) attributes {dimension_semantics = [#tpu.dimension_semantics<parallel>], iteration_bounds = array<i64: 1>, scalar_prefetch = 0 : i64, scratch_operands = 0 : i64, tpu.core_type = #tpu.core_type<tc>, window_params = [{transform_indices = @transform_0, window_bounds = array<i64: 4, 1, 2>}, {transform_indices = @transform_1, window_bounds = array<i64: 4, 2, 256>}, {transform_indices = @transform_2, window_bounds = array<i64: 4, 2, 256>}]} {
    %c0 = arith.constant 0 : index
    %c0_0 = arith.constant 0 : index
    %c0_1 = arith.constant 0 : index
    %0 = vector.load %arg2[%c0, %c0_0, %c0_1] : memref<4x2x256xf32, #tpu.memory_space<vmem>>, vector<4x2x256xf32>
    %cst = arith.constant dense<0.000000e+00> : vector<4x2xf32>
    %1 = vector.multi_reduction <add>, %0, %cst [2] : vector<4x2x256xf32> to vector<4x2xf32>
    %2 = vector.shape_cast %1 : vector<4x2xf32> to vector<4x2x1xf32>
    %cst_2 = arith.constant 3.906250e-03 : f32
    %3 = vector.broadcast %cst_2 : f32 to vector<4x2x1xf32>
    %4 = arith.mulf %2, %3 : vector<4x2x1xf32>
    %5 = vector.broadcast %4 : vector<4x2x1xf32> to vector<4x2x256xf32>
    %6 = arith.mulf %0, %5 : vector<4x2x256xf32>
    %cst_3 = arith.constant dense<0.000000e+00> : vector<4x256xf32>
    %7 = vector.multi_reduction <add>, %6, %cst_3 [1] : vector<4x2x256xf32> to vector<4x256xf32>
    %8 = vector.shape_cast %7 : vector<4x256xf32> to vector<4x1x256xf32>
    %cst_4 = arith.constant dense<0.000000e+00> : vector<4x1xf32>
    %9 = vector.multi_reduction <add>, %8, %cst_4 [2] : vector<4x1x256xf32> to vector<4x1xf32>
    %10 = vector.shape_cast %9 : vector<4x1xf32> to vector<4x1x1xf32>
    %cst_5 = arith.constant 3.906250e-03 : f32
    %11 = vector.broadcast %cst_5 : f32 to vector<4x1x1xf32>
    %12 = arith.mulf %10, %11 : vector<4x1x1xf32>
    %13 = vector.broadcast %12 : vector<4x1x1xf32> to vector<4x1x256xf32>
    %14 = arith.subf %8, %13 : vector<4x1x256xf32>
    %15 = arith.mulf %14, %14 : vector<4x1x256xf32>
    %cst_6 = arith.constant dense<0.000000e+00> : vector<4x1xf32>
    %16 = vector.multi_reduction <add>, %15, %cst_6 [2] : vector<4x1x256xf32> to vector<4x1xf32>
    %17 = vector.shape_cast %16 : vector<4x1xf32> to vector<4x1x1xf32>
    %cst_7 = arith.constant 0.00392156886 : f32
    %18 = vector.broadcast %cst_7 : f32 to vector<4x1x1xf32>
    %19 = arith.mulf %17, %18 : vector<4x1x1xf32>
    %20 = math.sqrt %19 : vector<4x1x1xf32>
    %cst_8 = arith.constant 9.99999974E-6 : f32
    %21 = vector.broadcast %cst_8 : f32 to vector<4x1x1xf32>
    %22 = arith.addf %20, %21 : vector<4x1x1xf32>
    %23 = vector.broadcast %22 : vector<4x1x1xf32> to vector<4x1x256xf32>
    %24 = arith.divf %14, %23 : vector<4x1x256xf32>
    %c0_9 = arith.constant 0 : index
    %c0_10 = arith.constant 0 : index
    %c0_11 = arith.constant 0 : index
    %25 = vector.load %arg1[%c0_9, %c0_10, %c0_11] : memref<4x1x2xf32, #tpu.memory_space<vmem>>, vector<4x1x2xf32>
    %26 = vector.extract_strided_slice %25 {offsets = [0, 0, 0], sizes = [4, 1, 1], strides = [1, 1, 1]} : vector<4x1x2xf32> to vector<4x1x1xf32>
    %27 = vector.broadcast %26 : vector<4x1x1xf32> to vector<4x1x256xf32>
    %28 = arith.mulf %24, %27 : vector<4x1x256xf32>
    %29 = vector.extract_strided_slice %25 {offsets = [0, 0, 1], sizes = [4, 1, 1], strides = [1, 1, 1]} : vector<4x1x2xf32> to vector<4x1x1xf32>
    %30 = vector.broadcast %29 : vector<4x1x1xf32> to vector<4x1x256xf32>
    %31 = arith.addf %28, %30 : vector<4x1x256xf32>
    %32 = arith.negf %31 : vector<4x1x256xf32>
    %33 = math.exp %32 : vector<4x1x256xf32>
    %cst_12 = arith.constant 1.000000e+00 : f32
    %34 = vector.broadcast %cst_12 : f32 to vector<4x1x256xf32>
    %35 = arith.addf %34, %33 : vector<4x1x256xf32>
    %36 = arith.divf %34, %35 : vector<4x1x256xf32>
    %37 = vector.broadcast %36 : vector<4x1x256xf32> to vector<4x2x256xf32>
    %38 = arith.mulf %0, %37 : vector<4x2x256xf32>
    %c0_13 = arith.constant 0 : index
    %c0_14 = arith.constant 0 : index
    %c0_15 = arith.constant 0 : index
    %39 = vector.load %arg3[%c0_13, %c0_14, %c0_15] : memref<4x2x256xf32, #tpu.memory_space<vmem>>, vector<4x2x256xf32>
    tpu.vector_store %arg3[%c0_13, %c0_14, %c0_15], %38 {strides = array<i32>} : memref<4x2x256xf32, #tpu.memory_space<vmem>>, vector<4x2x256xf32>,
    return
  }
  func.func @transform_0(%arg0: i32) -> (i32, i32, i32) {
    %c0_i32 = arith.constant 0 : i32
    %c0_i32_0 = arith.constant 0 : i32
    %c0_i32_1 = arith.constant 0 : i32
    return %arg0, %c0_i32, %c0_i32_0 : i32, i32, i32
  }
  func.func @transform_1(%arg0: i32) -> (i32, i32, i32) {
    %c0_i32 = arith.constant 0 : i32
    %c0_i32_0 = arith.constant 0 : i32
    %c0_i32_1 = arith.constant 0 : i32
    return %arg0, %c0_i32, %c0_i32_0 : i32, i32, i32
  }
  func.func @transform_2(%arg0: i32) -> (i32, i32, i32) {
    %c0_i32 = arith.constant 0 : i32
    %c0_i32_0 = arith.constant 0 : i32
    %c0_i32_1 = arith.constant 0 : i32
    return %arg0, %c0_i32, %c0_i32_0 : i32, i32, i32
  }
}

</mosaic_0001>

<bundles_post_ra>
// kernel: tpu_custom_call.1
= control target key start
LH: loop header
LB: loop body
LE: loop exit
PB: predicated region body
PF: predicated region fallthrough
CT: control target
= control target key end

     0   :  { %7 = vsyncpa [#allocation3], 0  ;;  %s925_s0 = inlined_call_operand.vmem [shape: f32[4,1,2], index: 0, kind: input, shape index: {}]   ;;  %s926_s1 = inlined_call_operand.hbm [shape: f32[4,2,256], index: 1, kind: input, shape index: {}]   ;;  %s927_s2 = inlined_call_operand.hbm [shape: f32[4,2,256], index: 2, kind: output, shape index: {}]  }
   0x1   :  { %8 = vsyncpa [#allocation4], 0  ;;  %s15_s11 = sshll.u32 %s926_s1, 4  ;;  %s739_s12 = smov [#allocation2]   ;;  %s16_s11 = int_to_ptr.hbm [resolvable:$true] %s15_s11 }
   0x2   :  { %s17_s13 = sshll.u32 %s739_s12, 4  ;;  %s740_s14 = smov 64   ;;  %s18_s13 = int_to_ptr.vmem [resolvable:$true] %s17_s13 }
   0x3   :  { %s741_s15 = smov 4  }
   0x4   :  { %23 = dma.hbm_to_vmem [thread:$0]  %s16_s11, 256, %s18_s13, [#allocation3], %s740_s14, %s740_s14, %s741_s15  }
   0x5   :  { %735 = dma.done.wait [#allocation3], 256  }
   0x6   :  { %736 = vsyncadd [#allocation3], 4294967040  ;;  %v767_v0 = vld [vmem:[#allocation2] sm:$0xf]  ;;  %v769_v1 = vld [vmem:[#allocation2 + $0x4] sm:$0xf] }
   0x7   :  { %36 = vst [vmem:[#allocation1] ss:$4 sm:$0xff] %v767_v0  ;;  %v773_v2 = vld [vmem:[#allocation2 + $0x8] sm:$0xf]  ;;  %vm57_vm0 = vcmask 1041408   ;;  %v743_v46 = vmov 0  }
   0x8   :  { %40 = vst [vmem:[#allocation1 + $0x20] ss:$4 sm:$0xff] %v769_v1  ;;  %v775_v3 = vld [vmem:[#allocation2 + $0xc] sm:$0xf]  ;;  %v742_v24 = vmov 269488144   ;;  %634 = vset.pattern.permute.xlu1 %v743_v46  ;;  %635 = vset.pattern.permute.xlu2 %v743_v46 }
   0x9   :  { %v87_v25 = vunpack.c.l.s4 %v742_v24  ;;  %633 = vset.pattern.permute.xlu0 %v743_v46  ;;  %s605_s26 = sshll.u32 %s927_s2, 4  ;;  %s606_s26 = int_to_ptr.hbm [resolvable:$true] %s605_s26 }
   0xb   :  { %v88_v26 = vunpack.c.0.s8 %v87_v25 }
   0xe   :  { %v37_v4 = vld.sshfl [vmem:[#allocation1] sm:$0xff pattern:$0x73625140]  ;;  %v38_v5 = vld.sshfl [vmem:[#allocation1 + $0x8] sm:$0xff pattern:$0x73625140] }
   0xf   :  { %v58_v6 = vsel %vm57_vm0, %v37_v4, 0.0  ;;  %v59_v7 = vsel %vm57_vm0, %v38_v5, 0.0  ;;  %43 = vst [vmem:[#allocation1] ss:$4 sm:$0xff] %v773_v2 }
  0x10   :  { %v60_v8 = vadd.f32 %v59_v7, %v58_v6  ;;  %v41_v9 = vld.sshfl [vmem:[#allocation1 + $0x20] sm:$0xff pattern:$0x73625140]  ;;  %v42_v10 = vld.sshfl [vmem:[#allocation1 + $0x28] sm:$0xff pattern:$0x73625140] }
  0x11   :  { %46 = vst [vmem:[#allocation1 + $0x20] ss:$4 sm:$0xff] %v775_v3  ;;  %v63_v11 = vsel %vm57_vm0, %v41_v9, 0.0  ;;  %v64_v12 = vsel %vm57_vm0, %v42_v10, 0.0 }
  0x12   :  { %61 = vadd.xlane.f32.xlu0 %v60_v8  ;;  %v65_v13 = vadd.f32 %v64_v12, %v63_v11 }
  0x16   :  { %v44_v14 = vld.sshfl [vmem:[#allocation1] sm:$0xff pattern:$0x73625140]  ;;  %v45_v15 = vld.sshfl [vmem:[#allocation1 + $0x8] sm:$0xff pattern:$0x73625140] }
  0x17   :  { %v68_v16 = vsel %vm57_vm0, %v44_v14, 0.0  ;;  %v69_v17 = vsel %vm57_vm0, %v45_v15, 0.0 }
  0x18   :  { %v70_v18 = vadd.f32 %v69_v17, %v68_v16  ;;  %v47_v19 = vld.sshfl [vmem:[#allocation1 + $0x20] sm:$0xff pattern:$0x73625140]  ;;  %v48_v20 = vld.sshfl [vmem:[#allocation1 + $0x28] sm:$0xff pattern:$0x73625140] }
  0x19   :  { %v73_v21 = vsel %vm57_vm0, %v47_v19, 0.0  ;;  %v74_v22 = vsel %vm57_vm0, %v48_v20, 0.0 }
  0x1a   :  { %66 = vadd.xlane.f32.xlu0 %v65_v13  ;;  %71 = vadd.xlane.f32.xlu1 %v70_v18  ;;  %v75_v23 = vadd.f32 %v74_v22, %v73_v21 }
  0x22   :  { %76 = vadd.xlane.f32.xlu1 %v75_v23 }
  0x85   :  { %v62_v27 = vpop.xlane.xlu0 %61 }
  0x86   :  { %v78_v28 = vmul.f32 0.00390625, %v62_v27 }
  0x88   :  { %v89_v29 = vperm.slane %v78_v28, %v88_v26 }
  0x8a   :  { %v106_v30 = vmul.f32 %v89_v29, %v767_v0 }
  0x8c   :  { %114 = vst [vmem:[#allocation1] ss:$4 sm:$0xff] %v106_v30 }
  0x8d   :  { %v67_v31 = vpop.xlane.xlu0 %66  ;;  %v72_v32 = vpop.xlane.xlu1 %71 }
  0x8e   :  { %v79_v33 = vmul.f32 0.00390625, %v67_v31  ;;  %v80_v34 = vmul.f32 0.00390625, %v72_v32 }
  0x90   :  { %v93_v35 = vperm.slane %v79_v33, %v88_v26  ;;  %v97_v36 = vperm.slane %v80_v34, %v88_v26 }
  0x92   :  { %v107_v37 = vmul.f32 %v93_v35, %v769_v1  ;;  %v108_v38 = vmul.f32 %v97_v36, %v773_v2 }
  0x93   :  { %v115_v39 = vld.sshfl [vmem:[#allocation1] sm:$0xff pattern:$0x73625140]  ;;  %v116_v40 = vld.sshfl [vmem:[#allocation1 + $0x8] sm:$0xff pattern:$0x73625140] }
  0x94   :  { %118 = vst [vmem:[#allocation1 + $0x20] ss:$4 sm:$0xff] %v107_v37  ;;  %v135_v41 = vsel %vm57_vm0, %v115_v39, 0.0  ;;  %v142_v42 = vsel %vm57_vm0, %v116_v40, 0.0 }
  0x95   :  { %v77_v43 = vpop.xlane.xlu1 %76  ;;  %v136_v44 = vrot.slane %v135_v41, 4  ;;  %v143_v45 = vrot.slane %v142_v42, 4  ;;  %121 = vst [vmem:[#allocation1] ss:$4 sm:$0xff] %v108_v38 }
  0x96   :  { %v81_v47 = vmul.f32 0.00390625, %v77_v43 }
  0x97   :  { %v137_v48 = vadd.f32 %v136_v44, %v135_v41  ;;  %v144_v49 = vadd.f32 %v143_v45, %v142_v42 }
  0x98   :  { %v101_v50 = vperm.slane %v81_v47, %v88_v26 }
  0x99   :  { %v138_v51 = vrot.slane %v137_v48, 2  ;;  %v145_v52 = vrot.slane %v144_v49, 2 }
  0x9a   :  { %v109_v53 = vmul.f32 %v101_v50, %v775_v3 }
  0x9b   :  { %v139_v54 = vadd.f32 %v138_v51, %v137_v48  ;;  %v146_v55 = vadd.f32 %v145_v52, %v144_v49  ;;  %v119_v56 = vld.sshfl [vmem:[#allocation1 + $0x20] sm:$0xff pattern:$0x73625140]  ;;  %v120_v57 = vld.sshfl [vmem:[#allocation1 + $0x28] sm:$0xff pattern:$0x73625140] }
  0x9c   :  { %v149_v58 = vsel %vm57_vm0, %v119_v56, 0.0  ;;  %v156_v59 = vsel %vm57_vm0, %v120_v57, 0.0  ;;  %124 = vst [vmem:[#allocation1 + $0x20] ss:$4 sm:$0xff] %v109_v53  ;;  %v356_v52 = vld [vmem:[%s925_s0 + $0x1] sm:$0x1] }
  0x9d   :  { %v140_v60 = vrot.slane %v139_v54, 1  ;;  %v147_v61 = vrot.slane %v146_v55, 1  ;;  %v150_v62 = vrot.slane %v149_v58, 4  ;;  %v157_v63 = vrot.slane %v156_v59, 4 }
  0x9e   :  { %v122_v4 = vld.sshfl [vmem:[#allocation1] sm:$0xff pattern:$0x73625140]  ;;  %v123_v5 = vld.sshfl [vmem:[#allocation1 + $0x8] sm:$0xff pattern:$0x73625140] }
  0x9f   :  { %v141_v6 = vadd.f32 %v140_v60, %v139_v54  ;;  %v148_v7 = vadd.f32 %v147_v61, %v146_v55  ;;  %v151_v8 = vadd.f32 %v150_v62, %v149_v58  ;;  %v158_v9 = vadd.f32 %v157_v63, %v156_v59 }
  0xa0   :  { %v163_v10 = vsel %vm57_vm0, %v122_v4, 0.0  ;;  %v170_v11 = vsel %vm57_vm0, %v123_v5, 0.0  ;;  %v744_v59 = vmov 1  }
  0xa1   :  { %v191_v12 = vadd.f32 %v148_v7, %v141_v6  ;;  %v152_v13 = vrot.slane %v151_v8, 2  ;;  %v159_v14 = vrot.slane %v158_v9, 2  ;;  %v164_v15 = vrot.slane %v163_v10, 4 }
  0xa2   :  { %v171_v16 = vrot.slane %v170_v11, 4 }
  0xa3   :  { %192 = vadd.xlane.f32.xlu2 %v191_v12  ;;  %v153_v17 = vadd.f32 %v152_v13, %v151_v8  ;;  %v160_v18 = vadd.f32 %v159_v14, %v158_v9  ;;  %v165_v19 = vadd.f32 %v164_v15, %v163_v10  ;;  %v125_v20 = vld.sshfl [vmem:[#allocation1 + $0x20] sm:$0xff pattern:$0x73625140]  ;;  %v126_v21 = vld.sshfl [vmem:[#allocation1 + $0x28] sm:$0xff pattern:$0x73625140] }
  0xa4   :  { %v172_v22 = vadd.f32 %v171_v16, %v170_v11  ;;  %v177_v23 = vsel %vm57_vm0, %v125_v20, 0.0  ;;  %v184_v24 = vsel %vm57_vm0, %v126_v21, 0.0  ;;  %v357_v15 = vld [vmem:[%s925_s0 + $0x2] sm:$0x1]  ;;  %v355_v16 = vld [vmem:[%s925_s0] sm:$0x1] }
  0xa5   :  { %v154_v25 = vrot.slane %v153_v17, 1  ;;  %v161_v26 = vrot.slane %v160_v18, 1  ;;  %v166_v27 = vrot.slane %v165_v19, 2  ;;  %v178_v28 = vrot.slane %v177_v23, 4 }
  0xa6   :  { %v173_v29 = vrot.slane %v172_v22, 2  ;;  %v185_v30 = vrot.slane %v184_v24, 4 }
  0xa7   :  { %v155_v31 = vadd.f32 %v154_v25, %v153_v17  ;;  %v162_v32 = vadd.f32 %v161_v26, %v160_v18  ;;  %v167_v33 = vadd.f32 %v166_v27, %v165_v19  ;;  %v179_v34 = vadd.f32 %v178_v28, %v177_v23  ;;  %v358_v17 = vld [vmem:[%s925_s0 + $0x3] sm:$0x1]  ;;  %s745_s0 = smov [#allocation5]  }
  0xa8   :  { %v174_v35 = vadd.f32 %v173_v29, %v172_v22  ;;  %v186_v36 = vadd.f32 %v185_v30, %v184_v24  ;;  %s603_s23 = sshll.u32 %s745_s0, 4  ;;  %s604_s23 = int_to_ptr.vmem [resolvable:$true] %s603_s23 }
  0xa9   :  { %v194_v37 = vadd.f32 %v162_v32, %v155_v31  ;;  %v168_v38 = vrot.slane %v167_v33, 1  ;;  %v180_v39 = vrot.slane %v179_v34, 2 }
  0xaa   :  { %v175_v40 = vrot.slane %v174_v35, 1  ;;  %v187_v41 = vrot.slane %v186_v36, 2 }
  0xab   :  { %195 = vadd.xlane.f32.xlu2 %v194_v37  ;;  %v169_v42 = vadd.f32 %v168_v38, %v167_v33  ;;  %v181_v43 = vadd.f32 %v180_v39, %v179_v34 }
  0xac   :  { %v176_v44 = vadd.f32 %v175_v40, %v174_v35  ;;  %v188_v45 = vadd.f32 %v187_v41, %v186_v36 }
  0xad   :  { %v182_v46 = vrot.slane %v181_v43, 1 }
  0xae   :  { %v197_v47 = vadd.f32 %v176_v44, %v169_v42  ;;  %v189_v48 = vrot.slane %v188_v45, 1 }
  0xaf   :  { %v183_v49 = vadd.f32 %v182_v46, %v181_v43 }
  0xb0   :  { %198 = vadd.xlane.f32.xlu0 %v197_v47  ;;  %v190_v50 = vadd.f32 %v189_v48, %v188_v45 }
  0xb2   :  { %v200_v51 = vadd.f32 %v190_v50, %v183_v49 }
  0xb4   :  { %201 = vadd.xlane.f32.xlu1 %v200_v51 }
  0xcd   :  { %367 = vperm.xlu1 %634, %v356_v52  }
  0xd5   :  { %636 = vset.pattern.permute.xlu1 %v744_v59 }
 0x116   :  { %v193_v53 = vpop.xlane.xlu2 %192 }
 0x117   :  { %v203_v54 = vmul.f32 0.00390625, %v193_v53 }
 0x119   :  { %v802_v55 = vsub.f32 %v141_v6, %v203_v54  ;;  %v804_v56 = vsub.f32 %v148_v7, %v203_v54 }
 0x11b   :  { %v215_v57 = vmul.f32 %v802_v55, %v802_v55  ;;  %v216_v58 = vmul.f32 %v804_v56, %v804_v56 }
 0x11d   :  { %v223_v60 = vadd.f32 %v216_v58, %v215_v57 }
 0x11e   :  { %v196_v61 = vpop.xlane.xlu2 %195 }
 0x11f   :  { %v204_v62 = vmul.f32 0.00390625, %v196_v61  ;;  %224 = vadd.xlane.f32.xlu2 %v223_v60 }
 0x121   :  { %v810_v63 = vsub.f32 %v155_v31, %v204_v62  ;;  %v812_v4 = vsub.f32 %v162_v32, %v204_v62 }
 0x123   :  { %v199_v5 = vpop.xlane.xlu0 %198  ;;  %v217_v6 = vmul.f32 %v810_v63, %v810_v63  ;;  %v218_v7 = vmul.f32 %v812_v4, %v812_v4 }
 0x124   :  { %v205_v8 = vmul.f32 0.00390625, %v199_v5 }
 0x125   :  { %v226_v9 = vadd.f32 %v218_v7, %v217_v6 }
 0x126   :  { %v818_v10 = vsub.f32 %v169_v42, %v205_v8  ;;  %v820_v11 = vsub.f32 %v176_v44, %v205_v8 }
 0x127   :  { %227 = vadd.xlane.f32.xlu0 %v226_v9  ;;  %v202_v18 = vpop.xlane.xlu1 %201 }
 0x128   :  { %v219_v12 = vmul.f32 %v818_v10, %v818_v10  ;;  %v220_v13 = vmul.f32 %v820_v11, %v820_v11  ;;  %v206_v19 = vmul.f32 0.00390625, %v202_v18 }
 0x12a   :  { %v229_v14 = vadd.f32 %v220_v13, %v219_v12  ;;  %v835_v20 = vsub.f32 %v183_v49, %v206_v19  ;;  %v837_v21 = vsub.f32 %v190_v50, %v206_v19 }
 0x12c   :  { %230 = vadd.xlane.f32.xlu1 %v229_v14  ;;  %v221_v22 = vmul.f32 %v835_v20, %v835_v20  ;;  %v222_v23 = vmul.f32 %v837_v21, %v837_v21 }
 0x12e   :  { %v232_v24 = vadd.f32 %v222_v23, %v221_v22 }
 0x137   :  { %373 = vperm.xlu2 %635, %v357_v15  }
 0x13b   :  { %361 = vperm.xlu0 %633, %v355_v16  }
 0x13f   :  { %v843_v27 = vpop.permute.xlu1 %367 }
 0x143   :  { %638 = vset.pattern.permute.xlu0 %v744_v59 }
 0x144   :  { %407 = vperm.xlu0 %638, %v358_v17  }
 0x145   :  { %392 = vperm.xlu1 %636, %v355_v16  }
 0x14d   :  { %402 = vperm.xlu1 %636, %v357_v15  }
 0x160   :  { %233 = vadd.xlane.f32.xlu2 %v232_v24 }
 0x178   :  { %379 = vperm.xlu2 %635, %v358_v17  }
 0x180   :  { %637 = vset.pattern.permute.xlu2 %v744_v59 }
 0x181   :  { %397 = vperm.xlu2 %637, %v356_v52  }
 0x192   :  { %v225_v25 = vpop.xlane.xlu2 %224 }
 0x193   :  { %v235_v26 = vmul.f32 0.003921569, %v225_v25 }
 0x195   :  { %639 = vrsqrt.f32 %v235_v26  ;;  %vm246_vm1 = vcmp.eq.f32.partialorder %v235_v26, inf  ;;  %v249_v42 = vand.u32 2147483648, %v235_v26  ;;  %vm248_vm2 = vcmp.eq.f32.partialorder %v235_v26, 0.0 }
 0x19a   :  { %v228_v28 = vpop.xlane.xlu0 %227 }
 0x19b   :  { %v640_v29 = vpop.eup %639  ;;  %v236_v30 = vmul.f32 0.003921569, %v228_v28 }
 0x19c   :  { %v240_v31 = vmul.f32 %v640_v29, %v235_v26 }
 0x19d   :  { %641 = vrsqrt.f32 %v236_v30  ;;  %vm258_vm3 = vcmp.eq.f32.partialorder %v236_v30, inf  ;;  %v261_v5 = vand.u32 2147483648, %v236_v30  ;;  %vm260_vm6 = vcmp.eq.f32.partialorder %v236_v30, 0.0 }
 0x19e   :  { %v241_v32 = vmul.f32 %v640_v29, %v240_v31 }
 0x19f   :  { %v231_v33 = vpop.xlane.xlu1 %230 }
 0x1a0   :  { %v242_v34 = vmul.f32 0.5, %v241_v32  ;;  %v237_v35 = vmul.f32 0.003921569, %v231_v33 }
 0x1a2   :  { %v243_v36 = vsub.f32 1.5, %v242_v34  ;;  %643 = vrsqrt.f32 %v237_v35  ;;  %vm270_vm4 = vcmp.eq.f32.partialorder %v237_v35, inf  ;;  %v273_v61 = vand.u32 2147483648, %v237_v35 }
 0x1a3   :  { %v642_v37 = vpop.eup %641  ;;  %vm272_vm5 = vcmp.eq.f32.partialorder %v237_v35, 0.0 }
 0x1a4   :  { %v244_v38 = vmul.f32 %v640_v29, %v243_v36  ;;  %v252_v39 = vmul.f32 %v642_v37, %v236_v30 }
 0x1a6   :  { %v245_v40 = vmul.f32 %v244_v38, %v235_v26  ;;  %v253_v41 = vmul.f32 %v642_v37, %v252_v39 }
 0x1a8   :  { %v644_v43 = vpop.eup %643  ;;  %v254_v44 = vmul.f32 0.5, %v253_v41  ;;  %v247_v45 = vsel %vm246_vm1, %v235_v26, %v245_v40 }
 0x1a9   :  { %v264_v46 = vmul.f32 %v644_v43, %v237_v35  ;;  %v250_v47 = vsel %vm248_vm2, %v249_v42, %v247_v45 }
 0x1aa   :  { %v255_v48 = vsub.f32 1.5, %v254_v44  ;;  %v287_v49 = vadd.f32 1e-05, %v250_v47 }
 0x1ab   :  { %v265_v50 = vmul.f32 %v644_v43, %v264_v46 }
 0x1ac   :  { %v256_v51 = vmul.f32 %v642_v37, %v255_v48  ;;  %645 = vrcp.f32 %v287_v49  ;;  %v300_v8 = vand.u32 2147483647, %v287_v49  ;;  %v302_v9 = vand.u32 2147483648, %v287_v49 }
 0x1ad   :  { %v266_v52 = vmul.f32 0.5, %v265_v50  ;;  %v362_v16 = vpop.permute.xlu0 %361  ;;  %vm296_vm8 = vweird.f32 %v287_v49 }
 0x1ae   :  { %v257_v54 = vmul.f32 %v256_v51, %v236_v30  ;;  %v303_v18 = vor.u32 1.1754944e-38, %v302_v9  ;;  %vm301_vm10 = vcmp.eq.f32.partialorder %v300_v8, 8.507059e+37  ;;  %v364_v24 = vperm.slane %v362_v16, 0 }
 0x1af   :  { %v267_v53 = vsub.f32 1.5, %v266_v52 }
 0x1b0   :  { %v259_v62 = vsel %vm258_vm3, %v236_v30, %v257_v54 }
 0x1b1   :  { %v268_v57 = vmul.f32 %v644_v43, %v267_v53  ;;  %v262_v15 = vsel %vm260_vm6, %v261_v5, %v259_v62 }
 0x1b2   :  { %v646_v58 = vpop.eup %645  ;;  %v845_v22 = vadd.f32 1e-05, %v262_v15 }
 0x1b3   :  { %v269_v59 = vmul.f32 %v268_v57, %v237_v35  ;;  %v292_v60 = vmul.f32 %v646_v58, %v287_v49  ;;  %vm297_vm7 = vweird.f32 %v646_v58 }
 0x1b4   :  { %vm298_vm9 = vmor %vm296_vm8, %vm297_vm7  ;;  %vm312_vm1 = vweird.f32 %v845_v22  ;;  %v316_v15 = vand.u32 2147483647, %v845_v22 }
 0x1b5   :  { %v293_v6 = vsub.f32 1.0, %v292_v60  ;;  %v271_v7 = vsel %vm270_vm4, %v237_v35, %v269_v59 }
 0x1b6   :  { %v274_v12 = vsel %vm272_vm5, %v273_v61, %v271_v7  ;;  %vm317_vm3 = vcmp.eq.f32.partialorder %v316_v15, 8.507059e+37 }
 0x1b7   :  { %v294_v13 = vmul.f32 %v646_v58, %v293_v6  ;;  %v289_v14 = vadd.f32 1e-05, %v274_v12  ;;  %v393_v19 = vpop.permute.xlu1 %392  ;;  %v318_v12 = vand.u32 2147483648, %v845_v22 }
 0x1b8   :  { %v395_v29 = vperm.slane %v393_v19, 0 }
 0x1b9   :  { %v295_v17 = vadd.f32 %v646_v58, %v294_v13  ;;  %647 = vrcp.f32 %v289_v14  ;;  %v334_v39 = vand.u32 2147483648, %v289_v14  ;;  %v332_v42 = vand.u32 2147483647, %v289_v14 }
 0x1ba   :  { %649 = vrcp.f32 %v845_v22  ;;  %vm328_vm12 = vweird.f32 %v289_v14 }
 0x1bb   :  { %v299_v23 = vsel %vm298_vm9, %v646_v58, %v295_v17  ;;  %v335_v43 = vor.u32 1.1754944e-38, %v334_v39  ;;  %vm333_vm14 = vcmp.eq.f32.partialorder %v332_v42, 8.507059e+37 }
 0x1bc   :  { %v304_v25 = vsel %vm301_vm10, %v303_v18, %v299_v23  ;;  %v319_v23 = vor.u32 1.1754944e-38, %v318_v12 }
 0x1bd   :  { %v305_v26 = vmul.f32 %v304_v25, %v802_v55  ;;  %v306_v28 = vmul.f32 %v304_v25, %v804_v56  ;;  %v374_v56 = vpop.permute.xlu2 %373 }
 0x1be   :  { %v376_v48 = vperm.slane %v374_v56, 0 }
 0x1bf   :  { %v648_v30 = vpop.eup %647  ;;  %v383_v31 = vmul.f32 %v364_v24, %v305_v26  ;;  %v384_v32 = vmul.f32 %v364_v24, %v306_v28  ;;  %v403_v47 = vpop.permute.xlu1 %402 }
 0x1c0   :  { %v324_v33 = vmul.f32 %v648_v30, %v289_v14  ;;  %v650_v40 = vpop.eup %649  ;;  %vm329_vm11 = vweird.f32 %v648_v30  ;;  %v405_v59 = vperm.slane %v403_v47, 0  ;;  %v370_v47 = vperm.slane %v843_v27, 0 }
 0x1c1   :  { %v411_v34 = vadd.f32 %v395_v29, %v383_v31  ;;  %v412_v35 = vadd.f32 %v395_v29, %v384_v32  ;;  %vm330_vm13 = vmor %vm328_vm12, %vm329_vm11  ;;  %v308_v44 = vmul.f32 %v650_v40, %v845_v22  ;;  %vm313_vm15 = vweird.f32 %v650_v40 }
 0x1c2   :  { %v325_v36 = vsub.f32 1.0, %v324_v33  ;;  %vm314_vm2 = vmor %vm312_vm1, %vm313_vm15 }
 0x1c3   :  { %v618_v37 = vmul.f32 -1.442695, %v411_v34  ;;  %v619_v38 = vmul.f32 -1.442695, %v412_v35  ;;  %v309_v52 = vsub.f32 1.0, %v308_v44 }
 0x1c4   :  { %v326_v41 = vmul.f32 %v648_v30, %v325_v36 }
 0x1c5   :  { %651 = vpow2.f32 %v618_v37  ;;  %v310_v61 = vmul.f32 %v650_v40, %v309_v52 }
 0x1c6   :  { %653 = vpow2.f32 %v619_v38  ;;  %v327_v55 = vadd.f32 %v648_v30, %v326_v41 }
 0x1c7   :  { %v311_v8 = vadd.f32 %v650_v40, %v310_v61 }
 0x1c8   :  { %v331_v45 = vsel %vm330_vm13, %v648_v30, %v327_v55 }
 0x1c9   :  { %v336_v46 = vsel %vm333_vm14, %v335_v43, %v331_v45  ;;  %v315_v18 = vsel %vm314_vm2, %v650_v40, %v311_v8 }
 0x1ca   :  { %v337_v49 = vmul.f32 %v336_v46, %v818_v10  ;;  %v338_v50 = vmul.f32 %v336_v46, %v820_v11  ;;  %v320_v29 = vsel %vm317_vm3, %v319_v23, %v315_v18 }
 0x1cb   :  { %v652_v51 = vpop.eup %651  ;;  %v321_v42 = vmul.f32 %v320_v29, %v810_v63  ;;  %v322_v56 = vmul.f32 %v320_v29, %v812_v4 }
 0x1cc   :  { %v654_v53 = vpop.eup %653  ;;  %v853_v54 = vadd.f32 1.0, %v652_v51  ;;  %v387_v57 = vmul.f32 %v376_v48, %v337_v49  ;;  %v388_v58 = vmul.f32 %v376_v48, %v338_v50 }
 0x1cd   :  { %v444_v60 = vadd.f32 1.0, %v654_v53  ;;  %v385_v63 = vmul.f32 %v370_v47, %v321_v42 }
 0x1ce   :  { %655 = vrcp.f32 %v853_v54  ;;  %v415_v62 = vadd.f32 %v405_v59, %v387_v57  ;;  %v416_v5 = vadd.f32 %v405_v59, %v388_v58  ;;  %v462_v31 = vand.u32 2147483648, %v853_v54 }
 0x1cf   :  { %657 = vrcp.f32 %v444_v60  ;;  %v477_v28 = vand.u32 2147483648, %v444_v60  ;;  %vm471_vm5 = vweird.f32 %v444_v60  ;;  %v475_v22 = vand.u32 2147483647, %v444_v60 }
 0x1d0   :  { %v622_v6 = vmul.f32 -1.442695, %v415_v62  ;;  %v623_v7 = vmul.f32 -1.442695, %v416_v5  ;;  %v460_v38 = vand.u32 2147483647, %v853_v54  ;;  %vm456_vm8 = vweird.f32 %v853_v54 }
 0x1d1   :  { %v478_v40 = vor.u32 1.1754944e-38, %v477_v28  ;;  %vm476_vm10 = vcmp.eq.f32.partialorder %v475_v22, 8.507059e+37  ;;  %v463_v55 = vor.u32 1.1754944e-38, %v462_v31  ;;  %v386_v57 = vmul.f32 %v370_v47, %v322_v56  ;;  %v408_v56 = vpop.permute.xlu0 %407 }
 0x1d2   :  { %659 = vpow2.f32 %v622_v6  ;;  %vm461_vm11 = vcmp.eq.f32.partialorder %v460_v38, 8.507059e+37 }
 0x1d3   :  { %v234_v10 = vpop.xlane.xlu2 %233  ;;  %661 = vpow2.f32 %v623_v7 }
 0x1d4   :  { %v656_v11 = vpop.eup %655  ;;  %v856_v9 = vmul.f32 0.003921569, %v234_v10 }
 0x1d5   :  { %v658_v13 = vpop.eup %657  ;;  %v452_v14 = vmul.f32 %v656_v11, %v853_v54  ;;  %vm457_vm6 = vweird.f32 %v656_v11 }
 0x1d6   :  { %v467_v16 = vmul.f32 %v658_v13, %v444_v60  ;;  %663 = vrsqrt.f32 %v856_v9  ;;  %vm472_vm4 = vweird.f32 %v658_v13  ;;  %vm458_vm9 = vmor %vm456_vm8, %vm457_vm6  ;;  %vm282_vm12 = vcmp.eq.f32.partialorder %v856_v9, inf }
 0x1d7   :  { %v453_v17 = vsub.f32 1.0, %v452_v14  ;;  %vm473_vm7 = vmor %vm471_vm5, %vm472_vm4  ;;  %v285_v7 = vand.u32 2147483648, %v856_v9  ;;  %vm284_vm13 = vcmp.eq.f32.partialorder %v856_v9, 0.0 }
 0x1d8   :  { %v468_v19 = vsub.f32 1.0, %v467_v16  ;;  %v660_v25 = vpop.eup %659 }
 0x1d9   :  { %v454_v24 = vmul.f32 %v656_v11, %v453_v17  ;;  %v662_v30 = vpop.eup %661  ;;  %v864_v32 = vadd.f32 1.0, %v660_v25 }
 0x1da   :  { %v469_v26 = vmul.f32 %v658_v13, %v468_v19  ;;  %v868_v37 = vadd.f32 1.0, %v662_v30 }
 0x1db   :  { %v866_v33 = vpop.permute.xlu2 %379  ;;  %v455_v35 = vadd.f32 %v656_v11, %v454_v24  ;;  %665 = vrcp.f32 %v864_v32  ;;  %v522_v16 = vand.u32 2147483648, %v864_v32  ;;  %vm516_vm2 = vweird.f32 %v864_v32 }
 0x1dc   :  { %v664_v34 = vpop.eup %663  ;;  %v470_v36 = vadd.f32 %v658_v13, %v469_v26  ;;  %667 = vrcp.f32 %v868_v37  ;;  %v537_v8 = vand.u32 2147483648, %v868_v37  ;;  %vm531_vm1 = vweird.f32 %v868_v37 }
 0x1dd   :  { %v276_v41 = vmul.f32 %v664_v34, %v856_v9  ;;  %v459_v43 = vsel %vm458_vm9, %v656_v11, %v455_v35  ;;  %v520_v19 = vand.u32 2147483647, %v864_v32  ;;  %v523_v30 = vor.u32 1.1754944e-38, %v522_v16 }
 0x1de   :  { %v474_v39 = vsel %vm473_vm7, %v658_v13, %v470_v36  ;;  %v464_v48 = vsel %vm461_vm11, %v463_v55, %v459_v43  ;;  %v538_v23 = vor.u32 1.1754944e-38, %v537_v8 }
 0x1df   :  { %v479_v44 = vsel %vm476_vm10, %v478_v40, %v474_v39  ;;  %v277_v45 = vmul.f32 %v664_v34, %v276_v41  ;;  %vm521_vm6 = vcmp.eq.f32.partialorder %v520_v19, 8.507059e+37 }
 0x1e0   :  { %v579_v46 = vrot.slane %v479_v44, 6 }
 0x1e1   :  { %v666_v49 = vpop.eup %665  ;;  %v278_v50 = vmul.f32 0.5, %v277_v45 }
 0x1e2   :  { %v583_v52 = vsel %vm57_vm0, %v464_v48, %v579_v46  ;;  %v668_v53 = vpop.eup %667  ;;  %v512_v54 = vmul.f32 %v666_v49, %v864_v32  ;;  %vm517_vm15 = vweird.f32 %v666_v49  ;;  %v382_v46 = vperm.slane %v866_v33, 0 }
 0x1e3   :  { %v398_v51 = vpop.permute.xlu2 %397  ;;  %v527_v4 = vmul.f32 %v668_v53, %v868_v37  ;;  %v279_v59 = vsub.f32 1.5, %v278_v50  ;;  %v591_v60 = vmul.f32 %v583_v52, %v767_v0  ;;  %vm532_vm14 = vweird.f32 %v668_v53  ;;  %vm518_vm4 = vmor %vm516_vm2, %vm517_vm15 }
 0x1e4   :  { %v400_v58 = vperm.slane %v398_v51, 0  ;;  %v513_v61 = vsub.f32 1.0, %v512_v54  ;;  %v535_v0 = vand.u32 2147483647, %v868_v37  ;;  %vm533_vm3 = vmor %vm531_vm1, %vm532_vm14  ;;  %v410_v50 = vperm.slane %v408_v56, 0 }
 0x1e5   :  { %v528_v5 = vsub.f32 1.0, %v527_v4  ;;  %v280_v6 = vmul.f32 %v664_v34, %v279_v59  ;;  %595 = vst [vmem:[#allocation5] sm:$0xf] %v591_v60 }
 0x1e6   :  { %v413_v27 = vadd.f32 %v400_v58, %v385_v63  ;;  %v414_v62 = vadd.f32 %v400_v58, %v386_v57  ;;  %v514_v10 = vmul.f32 %v666_v49, %v513_v61  ;;  %vm536_vm5 = vcmp.eq.f32.partialorder %v535_v0, 8.507059e+37 }
 0x1e7   :  { %v529_v13 = vmul.f32 %v668_v53, %v528_v5  ;;  %v281_v14 = vmul.f32 %v280_v6, %v856_v9 }
 0x1e8   :  { %v620_v11 = vmul.f32 -1.442695, %v413_v27  ;;  %v621_v12 = vmul.f32 -1.442695, %v414_v62  ;;  %v515_v15 = vadd.f32 %v666_v49, %v514_v10 }
 0x1e9   :  { %v530_v17 = vadd.f32 %v668_v53, %v529_v13  ;;  %v283_v18 = vsel %vm282_vm12, %v856_v9, %v281_v14 }
 0x1ea   :  { %669 = vpow2.f32 %v620_v11  ;;  %v286_v24 = vsel %vm284_vm13, %v285_v7, %v283_v18  ;;  %v519_v28 = vsel %vm518_vm4, %v666_v49, %v515_v15 }
 0x1eb   :  { %671 = vpow2.f32 %v621_v12  ;;  %v534_v25 = vsel %vm533_vm3, %v668_v53, %v530_v17  ;;  %v290_v26 = vadd.f32 1e-05, %v286_v24  ;;  %v524_v36 = vsel %vm521_vm6, %v523_v30, %v519_v28 }
 0x1ec   :  { %v539_v29 = vsel %vm536_vm5, %v538_v23, %v534_v25 }
 0x1ed   :  { %673 = vrcp.f32 %v290_v26  ;;  %v581_v22 = vrot.slane %v539_v29, 6  ;;  %v348_v42 = vand.u32 2147483647, %v290_v26  ;;  %v350_v55 = vand.u32 2147483648, %v290_v26 }
 0x1ee   :  { %vm344_vm8 = vweird.f32 %v290_v26 }
 0x1ef   :  { %v585_v37 = vsel %vm57_vm0, %v524_v36, %v581_v22  ;;  %vm349_vm10 = vcmp.eq.f32.partialorder %v348_v42, 8.507059e+37 }
 0x1f0   :  { %v670_v31 = vpop.eup %669  ;;  %v593_v38 = vmul.f32 %v585_v37, %v773_v2  ;;  %v351_v2 = vor.u32 1.1754944e-38, %v350_v55 }
 0x1f1   :  { %v672_v34 = vpop.eup %671  ;;  %v445_v35 = vadd.f32 1.0, %v670_v31 }
 0x1f2   :  { %v446_v32 = vadd.f32 1.0, %v672_v34  ;;  %597 = vst [vmem:[#allocation5 + $0x8] sm:$0xf] %v593_v38 }
 0x1f3   :  { %675 = vrcp.f32 %v445_v35  ;;  %v674_v9 = vpop.eup %673  ;;  %vm486_vm11 = vweird.f32 %v445_v35  ;;  %v492_v60 = vand.u32 2147483648, %v445_v35  ;;  %v490_v27 = vand.u32 2147483647, %v445_v35 }
 0x1f4   :  { %677 = vrcp.f32 %v446_v32  ;;  %v340_v39 = vmul.f32 %v674_v9, %v290_v26  ;;  %vm345_vm7 = vweird.f32 %v674_v9  ;;  %v507_v54 = vand.u32 2147483648, %v446_v32 }
 0x1f5   :  { %vm346_vm9 = vmor %vm344_vm8, %vm345_vm7  ;;  %v505_v58 = vand.u32 2147483647, %v446_v32  ;;  %vm501_vm15 = vweird.f32 %v446_v32  ;;  %v493_v8 = vor.u32 1.1754944e-38, %v492_v60  ;;  %vm491_vm3 = vcmp.eq.f32.partialorder %v490_v27, 8.507059e+37 }
 0x1f6   :  { %v341_v40 = vsub.f32 1.0, %v340_v39  ;;  %v508_v7 = vor.u32 1.1754944e-38, %v507_v54 }
 0x1f7   :  { %vm506_vm2 = vcmp.eq.f32.partialorder %v505_v58, 8.507059e+37 }
 0x1f8   :  { %v342_v44 = vmul.f32 %v674_v9, %v341_v40 }
 0x1f9   :  { %v676_v41 = vpop.eup %675 }
 0x1fa   :  { %v678_v43 = vpop.eup %677  ;;  %v482_v45 = vmul.f32 %v676_v41, %v445_v35  ;;  %v343_v48 = vadd.f32 %v674_v9, %v342_v44  ;;  %vm487_vm12 = vweird.f32 %v676_v41 }
 0x1fb   :  { %v497_v47 = vmul.f32 %v678_v43, %v446_v32  ;;  %vm502_vm13 = vweird.f32 %v678_v43  ;;  %vm903_vm14 = vmor %vm486_vm11, %vm487_vm12 }
 0x1fc   :  { %v483_v49 = vsub.f32 1.0, %v482_v45  ;;  %v347_v52 = vsel %vm346_vm9, %v674_v9, %v343_v48  ;;  %vm503_vm1 = vmor %vm501_vm15, %vm502_vm13 }
 0x1fd   :  { %v498_v51 = vsub.f32 1.0, %v497_v47  ;;  %v352_v63 = vsel %vm349_vm10, %v351_v2, %v347_v52 }
 0x1fe   :  { %v484_v53 = vmul.f32 %v676_v41, %v483_v49  ;;  %v353_v33 = vmul.f32 %v352_v63, %v835_v20  ;;  %v354_v4 = vmul.f32 %v352_v63, %v837_v21 }
 0x1ff   :  { %v499_v57 = vmul.f32 %v678_v43, %v498_v51 }
 0x200   :  { %v485_v59 = vadd.f32 %v676_v41, %v484_v53  ;;  %v389_v5 = vmul.f32 %v382_v46, %v353_v33  ;;  %v390_v6 = vmul.f32 %v382_v46, %v354_v4 }
 0x201   :  { %v500_v62 = vadd.f32 %v678_v43, %v499_v57 }
 0x202   :  { %v489_v20 = vsel %vm903_vm14, %v676_v41, %v485_v59  ;;  %v417_v21 = vadd.f32 %v410_v50, %v389_v5  ;;  %v418_v11 = vadd.f32 %v410_v50, %v390_v6 }
 0x203   :  { %v504_v10 = vsel %vm503_vm1, %v678_v43, %v500_v62  ;;  %v494_v15 = vsel %vm491_vm3, %v493_v8, %v489_v20 }
 0x204   :  { %v509_v12 = vsel %vm506_vm2, %v508_v7, %v504_v10  ;;  %v624_v0 = vmul.f32 -1.442695, %v417_v21  ;;  %v625_v14 = vmul.f32 -1.442695, %v418_v11 }
 0x205   :  { %v580_v13 = vrot.slane %v509_v12, 6 }
 0x206   :  { %679 = vpow2.f32 %v624_v0 }
 0x207   :  { %v584_v16 = vsel %vm57_vm0, %v494_v15, %v580_v13  ;;  %681 = vpow2.f32 %v625_v14 }
 0x208   :  { %v592_v17 = vmul.f32 %v584_v16, %v769_v1 }
 0x20a   :  { %596 = vst [vmem:[#allocation5 + $0x4] sm:$0xf] %v592_v17 }
 0x20c   :  { %v680_v18 = vpop.eup %679 }
 0x20d   :  { %v682_v19 = vpop.eup %681  ;;  %v449_v23 = vadd.f32 1.0, %v680_v18 }
 0x20e   :  { %v450_v24 = vadd.f32 1.0, %v682_v19 }
 0x20f   :  { %683 = vrcp.f32 %v449_v23  ;;  %vm546_vm6 = vweird.f32 %v449_v23  ;;  %v552_v32 = vand.u32 2147483648, %v449_v23  ;;  %v550_v9 = vand.u32 2147483647, %v449_v23 }
 0x210   :  { %685 = vrcp.f32 %v450_v24  ;;  %v567_v34 = vand.u32 2147483648, %v450_v24  ;;  %v565_v1 = vand.u32 2147483647, %v450_v24  ;;  %vm561_vm8 = vweird.f32 %v450_v24 }
 0x211   :  { %v553_v42 = vor.u32 1.1754944e-38, %v552_v32  ;;  %vm551_vm11 = vcmp.eq.f32.partialorder %v550_v9, 8.507059e+37 }
 0x212   :  { %v568_v39 = vor.u32 1.1754944e-38, %v567_v34  ;;  %vm566_vm10 = vcmp.eq.f32.partialorder %v565_v1, 8.507059e+37 }
 0x215   :  { %v684_v25 = vpop.eup %683 }
 0x216   :  { %v686_v26 = vpop.eup %685  ;;  %v542_v28 = vmul.f32 %v684_v25, %v449_v23  ;;  %vm547_vm4 = vweird.f32 %v684_v25 }
 0x217   :  { %v557_v29 = vmul.f32 %v686_v26, %v450_v24  ;;  %vm562_vm5 = vweird.f32 %v686_v26  ;;  %vm911_vm7 = vmor %vm546_vm6, %vm547_vm4 }
 0x218   :  { %v543_v30 = vsub.f32 1.0, %v542_v28  ;;  %vm563_vm9 = vmor %vm561_vm8, %vm562_vm5 }
 0x219   :  { %v558_v31 = vsub.f32 1.0, %v557_v29 }
 0x21a   :  { %v544_v22 = vmul.f32 %v684_v25, %v543_v30 }
 0x21b   :  { %v559_v35 = vmul.f32 %v686_v26, %v558_v31 }
 0x21c   :  { %v545_v36 = vadd.f32 %v684_v25, %v544_v22 }
 0x21d   :  { %v560_v38 = vadd.f32 %v686_v26, %v559_v35 }
 0x21e   :  { %v549_v41 = vsel %vm911_vm7, %v684_v25, %v545_v36 }
 0x21f   :  { %v564_v40 = vsel %vm563_vm9, %v686_v26, %v560_v38  ;;  %v554_v43 = vsel %vm551_vm11, %v553_v42, %v549_v41 }
 0x220   :  { %v569_v55 = vsel %vm566_vm10, %v568_v39, %v564_v40 }
 0x221   :  { %v582_v56 = vrot.slane %v569_v55, 6 }
 0x223   :  { %v586_v44 = vsel %vm57_vm0, %v554_v43, %v582_v56 }
 0x224   :  { %v594_v45 = vmul.f32 %v586_v44, %v775_v3 }
 0x226   :  { %598 = vst [vmem:[#allocation5 + $0xc] sm:$0xf] %v594_v45 }
 0x227   :  { %611 = dma.vmem_to_hbm [thread:$0]  %s604_s23, 256, %s606_s26, [#allocation4], %s740_s14, %s740_s14, %s741_s15  }
 0x228   :  { %737 = dma.done.wait [#allocation4], 256  }
 0x229   :  { %738 = vsyncadd [#allocation4], 4294967040 }
 0x22a   :  { %616 = vsyncpa [#allocation3], 1 }
 0x22b   :  { %617 = vsyncpa [#allocation4], 1 }

</bundles_post_ra>
